<compile_context>
chip_gen: v7x
topology: tpu7x:2x2x1
jax: 0.10.0
libtpu: 0.0.40
codegen_flags: <defaults>
</compile_context>

<pallas_src>
import math

import jax
import jax.numpy as jnp
from jax.experimental import pallas as pl
from jax.experimental.pallas import tpu as pltpu

_LANE = 128        # lane width  (last dim)
_SUBLANE_BF16 = 16  # sublane packing for bf16 (second-to-last dim)


def _round_up(v, m):
    return ((v + m - 1) // m) * m


def _pad2d(a, rows, cols):
    """Zero-pad a 1-D or 2-D array up to (rows, cols)."""
    a = jnp.asarray(a)
    if a.ndim == 1:
        a = a.reshape(1, -1)
    assert a.ndim == 2 and a.shape[0] <= rows and a.shape[1] <= cols
    if a.shape == (rows, cols):
        return a
    return jnp.zeros((rows, cols), a.dtype).at[: a.shape[0], : a.shape[1]].set(a)


# ----------------------------------------------------------------------------
# Kernel
# ----------------------------------------------------------------------------
def actor_kernel(x_ref, w1_ref, b1_ref, w2_ref, b2_ref, w3_ref, b3_ref, o_ref):
    # layer1: bf16 MXU matmul, f32 accumulate; bias + ReLU in f32 on the VPU.
    h1 = jnp.dot(x_ref[...], w1_ref[...], preferred_element_type=jnp.float32)
    h1 = jnp.maximum(h1 + b1_ref[...], 0.0)
    # layer2
    h2 = jnp.dot(h1.astype(w2_ref.dtype), w2_ref[...],
                 preferred_element_type=jnp.float32)
    h2 = jnp.maximum(h2 + b2_ref[...], 0.0)
    # layer3 + tanh (EUP slot) scaled by a single VPU multiply (* 0.1).
    h3 = jnp.dot(h2.astype(w3_ref.dtype), w3_ref[...],
                 preferred_element_type=jnp.float32)
    o_ref[...] = (jnp.tanh(h3 + b3_ref[...]) * 0.1).astype(o_ref.dtype)


# ----------------------------------------------------------------------------
# One-time parameter preparation (pad + cast ONCE, not per forward call)
# ----------------------------------------------------------------------------
def prepare_actor_params(params, *, compute_dtype=jnp.bfloat16):
    """Pad weights/biases to lane boundaries and cast weights to bf16, once."""
    w1, b1, w2, b2, w3, b3 = params
    n_input, n_hidden = w1.shape
    n_output = w3.shape[1]

    n_hid_p = _round_up(n_hidden, _LANE)
    n_out_p = _round_up(n_output, _LANE)

    # W1 keeps its true input dim (x is never feature-padded); only the output
    # dims of the weights are padded.  Zero padding is mathematically inert:
    # padded hidden units get bias 0 -> ReLU(0)=0 -> contribute nothing.
    w1p = _pad2d(w1, n_input, n_hid_p).astype(compute_dtype)
    w2p = _pad2d(w2, n_hid_p, n_hid_p).astype(compute_dtype)
    w3p = _pad2d(w3, n_hid_p, n_out_p).astype(compute_dtype)
    # Biases stay f32 (the bias add / activations run in f32).
    b1p = _pad2d(b1, 1, n_hid_p).astype(jnp.float32)
    b2p = _pad2d(b2, 1, n_hid_p).astype(jnp.float32)
    b3p = _pad2d(b3, 1, n_out_p).astype(jnp.float32)

    prepped = (w1p, b1p, w2p, b2p, w3p, b3p)
    return prepped, n_output


# ----------------------------------------------------------------------------
# Forward pass
# ----------------------------------------------------------------------------
def actor_forward(x, prepped, n_output, *, tile_batch=1024):
    """Run the Actor MLP forward pass with a batch-tiled Pallas kernel."""
    w1p, b1p, w2p, b2p, w3p, b3p = prepped
    batch, n_input = x.shape
    assert w1p.shape[0] == n_input, "x feature dim must match W1 input dim"
    n_hid_p = w1p.shape[1]
    n_out_p = w3p.shape[1]
    compute_dtype = w1p.dtype

    # --- batch tile selection --------------------------------------------
    # Large tiles amortize per-step overhead; but keep >= 2 grid steps when
    # the batch allows so "parallel" can shard across v7x's two TensorCores.
    tb = _round_up(min(int(tile_batch), batch), _SUBLANE_BF16)
    if batch > _SUBLANE_BF16 and pl.cdiv(batch, tb) < 2:
        tb = _round_up(pl.cdiv(batch, 2), _SUBLANE_BF16)
    batch_p = _round_up(batch, tb)
    grid = (batch_p // tb,)

    # --- input: cast to bf16 (halves x DMA bytes); pad batch only if needed
    xk = x.astype(compute_dtype)
    if batch_p != batch:
        xk = jnp.pad(xk, ((0, batch_p - batch), (0, 0)))

    # --- block specs: x/out pipeline over the grid, weights stay resident --
    const0 = lambda i: (0, 0)
    in_specs = [
        pl.BlockSpec((tb, n_input), lambda i: (i, 0)),   # x (pipelined, true feature dim)
        pl.BlockSpec(w1p.shape, const0),                 # w1 (resident)
        pl.BlockSpec(b1p.shape, const0),                 # b1
        pl.BlockSpec(w2p.shape, const0),                 # w2
        pl.BlockSpec(b2p.shape, const0),                 # b2
        pl.BlockSpec(w3p.shape, const0),                 # w3
        pl.BlockSpec(b3p.shape, const0),                 # b3
    ]
    out_specs = pl.BlockSpec((tb, n_out_p), lambda i: (i, 0))

    # --- VMEM budget, capped at 3/4 of the physical per-TC VMEM ------------
    bsz = jnp.dtype(compute_dtype).itemsize
    f32 = 4
    weight_bytes = (n_input * n_hid_p + n_hid_p * n_hid_p + n_hid_p * n_out_p) * bsz
    bias_bytes = (2 * n_hid_p + n_out_p) * f32
    io_tile_bytes = tb * n_input * bsz + tb * n_out_p * f32
    act_bytes = 2 * tb * n_hid_p * f32                    # h1/h2 intermediates
    needed = 2 * (weight_bytes + bias_bytes + io_tile_bytes) + act_bytes + (4 << 20)
    try:
        vmem_cap = int(pltpu.get_tpu_info().vmem_capacity_bytes)
    except Exception:  # pragma: no cover - conservative fallback (v7x-sized)
        vmem_cap = 64 << 20
    vmem_limit = int(min(max(needed, 16 << 20), (vmem_cap * 3) // 4))

    # --- cost hint so XLA can schedule/overlap around the call -------------
    flops = 2 * batch_p * (n_input * n_hid_p + n_hid_p * n_hid_p + n_hid_p * n_out_p)
    bytes_accessed = (
        batch_p * n_input * bsz
        + (n_input * n_hid_p + n_hid_p * n_hid_p + n_hid_p * n_out_p) * bsz
        + (2 * n_hid_p + n_out_p) * f32
        + batch_p * n_out_p * f32
    )
    cost = pl.CostEstimate(
        flops=flops,
        transcendentals=batch_p * n_out_p,
        bytes_accessed=bytes_accessed,
    )

    out_padded = pl.pallas_call(
        actor_kernel,
        out_shape=jax.ShapeDtypeStruct((batch_p, n_out_p), jnp.float32),
        grid=grid,
        in_specs=in_specs,
        out_specs=out_specs,
        compiler_params=pltpu.CompilerParams(
            dimension_semantics=("parallel",),
            vmem_limit_bytes=vmem_limit,
        ),
        cost_estimate=cost,
    )(xk, w1p, b1p, w2p, b2p, w3p, b3p)

    # Slice padding off.  Keep this inside the caller's jit so XLA fuses it
    # with the consumer of the action.
    return out_padded[:batch, :n_output]


# ----------------------------------------------------------------------------
# Init (matches the PyTorch module) + pure-JAX reference
# ----------------------------------------------------------------------------
def xavier_uniform(key, fan_in, fan_out, gain=1.0):
    # Matches torch.nn.init.xavier_uniform_ (gain=1); returned in (in, out)
    # layout so the kernel computes x @ W directly.
    limit = gain * math.sqrt(6.0 / (fan_in + fan_out))
    return jax.random.uniform(
        key, (fan_in, fan_out), dtype=jnp.float32, minval=-limit, maxval=limit
    )


def init_actor_params(key, n_input, n_output, n_hidden):
    k1, k2, k3 = jax.random.split(key, 3)
    w1 = xavier_uniform(k1, n_input, n_hidden)
    b1 = jnp.zeros((n_hidden,), jnp.float32)      # 1-D biases, PyTorch-style
    w2 = xavier_uniform(k2, n_hidden, n_hidden)
    b2 = jnp.zeros((n_hidden,), jnp.float32)
    w3 = xavier_uniform(k3, n_hidden, n_output)
    b3 = jnp.zeros((n_output,), jnp.float32)
    return (w1, b1, w2, b2, w3, b3)


def actor_reference(x, params):
    # Pure-JAX f32 reference of the original module's forward pass.
    w1, b1, w2, b2, w3, b3 = params
    h = jnp.maximum(x @ w1 + b1, 0.0)
    h = jnp.maximum(h @ w2 + b2, 0.0)
    return jnp.tanh(h @ w3 + b3) / 10.0


if __name__ == "__main__":
    key = jax.random.PRNGKey(0)
    k_params, k_x = jax.random.split(key)

    # Small shapes consistent with the Actor module.  batch=32 with the tile
    # heuristic yields a 2-step grid (exercises the pipeline / dual-TC path).
    batch, n_input, n_hidden, n_output = 32, 16, 32, 4
    params = init_actor_params(k_params, n_input, n_output, n_hidden)
    prepped, n_out = prepare_actor_params(params)   # pad + bf16-cast ONCE
    x = jax.random.normal(k_x, (batch, n_input), dtype=jnp.float32)

    fwd = jax.jit(lambda xx, pp: actor_forward(xx, pp, n_out))
    out = jax.block_until_ready(fwd(x, prepped))

    ref = actor_reference(x, params)
    assert out.shape == (batch, n_output)
    # bf16 MXU matmuls (f32 accumulation) -> loosened tolerance vs f32 ref.
    max_err = float(jnp.max(jnp.abs(out - ref)))
    assert jnp.allclose(out, ref, atol=5e-3, rtol=5e-2), max_err

    print("KERNEL_OK")
</pallas_src>

<mosaic_0001>
module attributes {stable_mosaic.version = 11 : i64} {
  func.func @actor_kernel(%arg0: i32, %arg1: memref<16x16xbf16, #tpu.memory_space<vmem>>, %arg2: memref<16x128xbf16, #tpu.memory_space<vmem>>, %arg3: memref<1x128xf32, #tpu.memory_space<vmem>>, %arg4: memref<128x128xbf16, #tpu.memory_space<vmem>>, %arg5: memref<1x128xf32, #tpu.memory_space<vmem>>, %arg6: memref<128x128xbf16, #tpu.memory_space<vmem>>, %arg7: memref<1x128xf32, #tpu.memory_space<vmem>>, %arg8: memref<16x128xf32, #tpu.memory_space<vmem>>) attributes {dimension_semantics = [#tpu.dimension_semantics<parallel>], iteration_bounds = array<i64: 2>, scalar_prefetch = 0 : i64, scratch_operands = 0 : i64, tpu.core_type = #tpu.core_type<tc>, window_params = [{transform_indices = @transform_0, window_bounds = array<i64: 16, 16>}, {pipeline_mode = #tpu.pipeline_mode<synchronous>, transform_indices = @transform_1, window_bounds = array<i64: 16, 128>}, {pipeline_mode = #tpu.pipeline_mode<synchronous>, transform_indices = @transform_2, window_bounds = array<i64: 1, 128>}, {pipeline_mode = #tpu.pipeline_mode<synchronous>, transform_indices = @transform_3, window_bounds = array<i64: 128, 128>}, {pipeline_mode = #tpu.pipeline_mode<synchronous>, transform_indices = @transform_4, window_bounds = array<i64: 1, 128>}, {pipeline_mode = #tpu.pipeline_mode<synchronous>, transform_indices = @transform_5, window_bounds = array<i64: 128, 128>}, {pipeline_mode = #tpu.pipeline_mode<synchronous>, transform_indices = @transform_6, window_bounds = array<i64: 1, 128>}, {transform_indices = @transform_7, window_bounds = array<i64: 16, 128>}]} {
    %c0 = arith.constant 0 : index
    %c0_0 = arith.constant 0 : index
    %0 = vector.load %arg1[%c0, %c0_0] : memref<16x16xbf16, #tpu.memory_space<vmem>>, vector<16x16xbf16>
    %c0_1 = arith.constant 0 : index
    %c0_2 = arith.constant 0 : index
    %1 = vector.load %arg2[%c0_1, %c0_2] : memref<16x128xbf16, #tpu.memory_space<vmem>>, vector<16x128xbf16>
    %cst = arith.constant dense<0.000000e+00> : vector<16x128xf32>
    %2 = tpu.matmul %0, %1, %cst {dimension_numbers = #tpu.dot_dimension_numbers<[1], [0], [0], [1], [0, 0, 1, 1], [], []>} : vector<16x16xbf16>, vector<16x128xbf16>, vector<16x128xf32> -> vector<16x128xf32>
    %c0_3 = arith.constant 0 : index
    %c0_4 = arith.constant 0 : index
    %3 = vector.load %arg3[%c0_3, %c0_4] : memref<1x128xf32, #tpu.memory_space<vmem>>, vector<1x128xf32>
    %4 = vector.broadcast %3 : vector<1x128xf32> to vector<16x128xf32>
    %5 = arith.addf %2, %4 : vector<16x128xf32>
    %cst_5 = arith.constant 0.000000e+00 : f32
    %6 = vector.broadcast %cst_5 : f32 to vector<16x128xf32>
    %7 = arith.maximumf %5, %6 : vector<16x128xf32>
    %8 = arith.truncf %7 : vector<16x128xf32> to vector<16x128xbf16>
    %c0_6 = arith.constant 0 : index
    %c0_7 = arith.constant 0 : index
    %9 = vector.load %arg4[%c0_6, %c0_7] : memref<128x128xbf16, #tpu.memory_space<vmem>>, vector<128x128xbf16>
    %cst_8 = arith.constant dense<0.000000e+00> : vector<16x128xf32>
    %10 = tpu.matmul %8, %9, %cst_8 {dimension_numbers = #tpu.dot_dimension_numbers<[1], [0], [0], [1], [0, 0, 1, 1], [], []>} : vector<16x128xbf16>, vector<128x128xbf16>, vector<16x128xf32> -> vector<16x128xf32>
    %c0_9 = arith.constant 0 : index
    %c0_10 = arith.constant 0 : index
    %11 = vector.load %arg5[%c0_9, %c0_10] : memref<1x128xf32, #tpu.memory_space<vmem>>, vector<1x128xf32>
    %12 = vector.broadcast %11 : vector<1x128xf32> to vector<16x128xf32>
    %13 = arith.addf %10, %12 : vector<16x128xf32>
    %cst_11 = arith.constant 0.000000e+00 : f32
    %14 = vector.broadcast %cst_11 : f32 to vector<16x128xf32>
    %15 = arith.maximumf %13, %14 : vector<16x128xf32>
    %16 = arith.truncf %15 : vector<16x128xf32> to vector<16x128xbf16>
    %c0_12 = arith.constant 0 : index
    %c0_13 = arith.constant 0 : index
    %17 = vector.load %arg6[%c0_12, %c0_13] : memref<128x128xbf16, #tpu.memory_space<vmem>>, vector<128x128xbf16>
    %cst_14 = arith.constant dense<0.000000e+00> : vector<16x128xf32>
    %18 = tpu.matmul %16, %17, %cst_14 {dimension_numbers = #tpu.dot_dimension_numbers<[1], [0], [0], [1], [0, 0, 1, 1], [], []>} : vector<16x128xbf16>, vector<128x128xbf16>, vector<16x128xf32> -> vector<16x128xf32>
    %c0_15 = arith.constant 0 : index
    %c0_16 = arith.constant 0 : index
    %19 = vector.load %arg7[%c0_15, %c0_16] : memref<1x128xf32, #tpu.memory_space<vmem>>, vector<1x128xf32>
    %20 = vector.broadcast %19 : vector<1x128xf32> to vector<16x128xf32>
    %21 = arith.addf %18, %20 : vector<16x128xf32>
    %22 = math.tanh %21 : vector<16x128xf32>
    %cst_17 = arith.constant 1.000000e-01 : f32
    %23 = vector.broadcast %cst_17 : f32 to vector<16x128xf32>
    %24 = arith.mulf %22, %23 : vector<16x128xf32>
    %c0_18 = arith.constant 0 : index
    %c0_19 = arith.constant 0 : index
    %25 = vector.load %arg8[%c0_18, %c0_19] : memref<16x128xf32, #tpu.memory_space<vmem>>, vector<16x128xf32>
    tpu.vector_store %arg8[%c0_18, %c0_19], %24 {strides = array<i32>} : memref<16x128xf32, #tpu.memory_space<vmem>>, vector<16x128xf32>,
    return
  }
  func.func @transform_0(%arg0: i32) -> (i32, i32) {
    %c0_i32 = arith.constant 0 : i32
    %c0_i32_0 = arith.constant 0 : i32
    return %arg0, %c0_i32 : i32, i32
  }
  func.func @transform_1(%arg0: i32) -> (i32, i32) {
    %c0_i32 = arith.constant 0 : i32
    %c0_i32_0 = arith.constant 0 : i32
    %c0_i32_1 = arith.constant 0 : i32
    return %c0_i32, %c0_i32_0 : i32, i32
  }
  func.func @transform_2(%arg0: i32) -> (i32, i32) {
    %c0_i32 = arith.constant 0 : i32
    %c0_i32_0 = arith.constant 0 : i32
    %c0_i32_1 = arith.constant 0 : i32
    return %c0_i32, %c0_i32_0 : i32, i32
  }
  func.func @transform_3(%arg0: i32) -> (i32, i32) {
    %c0_i32 = arith.constant 0 : i32
    %c0_i32_0 = arith.constant 0 : i32
    %c0_i32_1 = arith.constant 0 : i32
    return %c0_i32, %c0_i32_0 : i32, i32
  }
  func.func @transform_4(%arg0: i32) -> (i32, i32) {
    %c0_i32 = arith.constant 0 : i32
    %c0_i32_0 = arith.constant 0 : i32
    %c0_i32_1 = arith.constant 0 : i32
    return %c0_i32, %c0_i32_0 : i32, i32
  }
  func.func @transform_5(%arg0: i32) -> (i32, i32) {
    %c0_i32 = arith.constant 0 : i32
    %c0_i32_0 = arith.constant 0 : i32
    %c0_i32_1 = arith.constant 0 : i32
    return %c0_i32, %c0_i32_0 : i32, i32
  }
  func.func @transform_6(%arg0: i32) -> (i32, i32) {
    %c0_i32 = arith.constant 0 : i32
    %c0_i32_0 = arith.constant 0 : i32
    %c0_i32_1 = arith.constant 0 : i32
    return %c0_i32, %c0_i32_0 : i32, i32
  }
  func.func @transform_7(%arg0: i32) -> (i32, i32) {
    %c0_i32 = arith.constant 0 : i32
    %c0_i32_0 = arith.constant 0 : i32
    return %arg0, %c0_i32 : i32, i32
  }
}

</mosaic_0001>

<bundles_post_ra>
// kernel: _lambda_.1
= control target key start
LH: loop header
LB: loop body
LE: loop exit
PB: predicated region body
PF: predicated region fallthrough
CT: control target
= control target key end

     0   :  { %12 = vsyncpa [#allocation3], 0  ;;  %s1126_s0 = inlined_call_operand.vmem [shape: bf16[32,16], index: 0, kind: input, shape index: {}]   ;;  %s1127_s1 = inlined_call_operand.hbm [shape: bf16[16,128], index: 1, kind: input, shape index: {}]   ;;  %s1128_s2 = inlined_call_operand.vmem [shape: f32[1,128], index: 2, kind: input, shape index: {}]   ;;  %s1129_s3 = inlined_call_operand.hbm [shape: bf16[128,128], index: 3, kind: input, shape index: {}]   ;;  %s1130_s4 = inlined_call_operand.vmem [shape: f32[1,128], index: 4, kind: input, shape index: {}]   ;;  %s1131_s5 = inlined_call_operand.vmem [shape: bf16[128,128], index: 5, kind: input, shape index: {}]   ;;  %s1132_s6 = inlined_call_operand.vmem [shape: f32[1,128], index: 6, kind: input, shape index: {}]   ;;  %s1133_s7 = inlined_call_operand.vmem [shape: f32[32,128], index: 7, kind: output, shape index: {}]  }
   0x1   :  { %13 = vsyncpa [#allocation5], 0  ;;  %s970_s24 = smov 0  }
   0x2 LB: > { %s694_s25 = sadd.s32 4294967295, %s922_s24   ;;  %p696_p0 = scmp.ge.s32.totalorder %s922_s24, 1  ;;  %s922_s24 = sphi %s970_s24, %s19_s24  }
   0x3   : > { %p202_p1 = scmp.lt.s32.totalorder %s922_s24, 3  ;;  %s924_s26 = smov [#allocation2]  }
   0x4   : > { %s214_s27 = sshll.u32 %s924_s26, 4  ;;  %p984_p3 = scmp.eq.s32.totalorder %s694_s25, 0  ;;  %s215_s27 = int_to_ptr.vmem [resolvable:$true] %s214_s27 }
   0x5   : > { %p978_p2 = pnand %p696_p0, %p202_p1  ;;  %s925_s30 = smov [#allocation4]  }
   0x6   : > { %s1138_s29 = scalar_select %p984_p3, 1, 0 }
   0x7   : > { %s1137_s28 = scalar_select %p978_p2, 1, 0 }
   0x8   : > { %p805_p4 = pneg %p978_p2  ;;  %s230_s8 = sshll.u32 %s925_s30, 4  ;;  %s996_s8 = int_to_ptr.vmem [resolvable:$true] %s230_s8 }
   0x9   : > { %s852_s12 = scalar_lea.hbm %s1127_s1, 128 }
   0xa   : > { %p992_p5 = pnand %p984_p3, %p805_p4  ;;  %p853_p6 = scmp.ne.s32.totalorder %s1127_s1, %s852_s12 }
   0xb   : > { %p859_p10 = scmp.lt.u32.totalorder %s852_s12, %s1127_s1 }
   0xc   : > { %p854_p7 = pneg %p992_p5 }
   0xe   : > { %p855_p8 = pnand %p854_p7, %p853_p6 }
  0x10   : > { %p856_p9 = pneg %p855_p8 }
  0x12   : > { %p861_p11 = pnand %p859_p10, %p856_p9 }
  0x14   : > { %864 = shalt.err (!%p861_p11)
}
  0x15   : > { %s865_s17 = scalar_lea.vmem %s215_s27, 128  ;;  %p873_p1 = scmp.lt.s32.totalorder %s215_s27, %s215_s27 }
  0x16   : > { %p866_p12 = scmp.ne.s32.totalorder %s215_s27, %s865_s17  ;;  %p874_p4 = scmp.lt.s32.totalorder %s865_s17, %s865_s17 }
  0x18   : > { %p868_p13 = pnand %p866_p12, %p854_p7  ;;  %p875_p3 = por %p874_p4, %p873_p1 }
  0x1a   : > { %p869_p0 = pneg %p868_p13 }
  0x1c   : > { %p876_p2 = pnand %p875_p3, %p869_p0 }
  0x1e   : > { %879 = shalt.err (!%p876_p2)
}
  0x1f   : > { %s926_s18 = smov 64   ;;  %s927_s19 = smov 4  }
  0x20   : > { %808 = dma.hbm_to_vmem [thread:$0]  (!%p992_p5), %s1127_s1, 128, %s215_s27, [#allocation3], %s926_s18, %s926_s18, %s927_s19  }
  0x21   : > { %s880_s26 = scalar_lea.hbm %s1129_s3, 1024 }
  0x22   : > { %p881_p6 = scmp.ne.s32.totalorder %s1129_s3, %s880_s26  ;;  %p887_p8 = scmp.lt.u32.totalorder %s880_s26, %s1129_s3 }
  0x24   : > { %p883_p2 = pnand %p881_p6, %p854_p7 }
  0x26   : > { %p884_p3 = pneg %p883_p2 }
  0x28   : > { %p889_p9 = pnand %p887_p8, %p884_p3 }
  0x2a   : > { %892 = shalt.err (!%p889_p9)
}
  0x2b   : > { %s893_s27 = scalar_lea.vmem %s996_s8, 1024  ;;  %p901_p13 = scmp.lt.s32.totalorder %s996_s8, %s996_s8 }
  0x2c   : > { %p894_p10 = scmp.ne.s32.totalorder %s996_s8, %s893_s27  ;;  %p902_p0 = scmp.lt.s32.totalorder %s893_s27, %s893_s27 }
  0x2e   : > { %p896_p11 = pnand %p894_p10, %p854_p7  ;;  %p903_p1 = por %p902_p0, %p901_p13 }
  0x30   : > { %p897_p12 = pneg %p896_p11 }
  0x32   : > { %p904_p4 = pnand %p903_p1, %p897_p12 }
  0x34   : > { %907 = shalt.err (!%p904_p4)
}
  0x35   : > { %811 = dma.hbm_to_vmem [thread:$0]  (!%p992_p5), %s1129_s3, 1024, %s996_s8, [#allocation5], %s926_s18, %s926_s18, %s927_s19  }
  0x36   : > { %p1140_p6 = scmp.ne.s32.totalorder %s1137_s28, 0 }
  0x37   : > { %p1141_p2 = scmp.ne.s32.totalorder (!%p1140_p6), %s1138_s29, 0 }
  0x38   : > { %264 = sbr.rel (%p1140_p6) target bundleno = 743 (0x2e7), region = 48 }
  0x3f   : > { %913 = dma.done.wait (%p1141_p2), [#allocation3], 128  }
  0x40   : > { %915 = vsyncadd (%p1141_p2), [#allocation3], 4294967168 }
  0x41   : > { %917 = dma.done.wait (%p1141_p2), [#allocation5], 1024  }
  0x42   : > { %919 = vsyncadd (%p1141_p2), [#allocation5], 4294966272  ;;  %s703_s9 = sshll.u32 %s694_s25, 1  ;;  %v928_v0 = vmov 0.0   ;;  %vm929_vm0 = vmmov 0   ;;  %v830_v1 = vld [vmem:[#allocation2] sm:$0xff]  }
  0x43   : > { %751 = vmatprep.subr.bf16.mxu0 %v928_v0  ;;  %753 = vmatprep.mubr.msk.bf16.mxu0 %vm929_vm0, %v928_v0  ;;  %p301_p5 = scmp.lt.s32.totalorder %s703_s9, 3  ;;  %vm335_vm1 = vcmask 130048   ;;  %v832_v3 = vld [vmem:[#allocation4] sm:$0xff]   ;;  %v833_v4 = vld [vmem:[#allocation4 + $0x8] sm:$0xff]   ;;  %v834_v5 = vld [vmem:[#allocation4 + $0x10] sm:$0xff]  }
  0x44   : > { %757 = vmatprep.subr.bf16.mxu1 %v928_v0  ;;  %773 = vmatprep.mubr.msk.bf16.mxu1 %vm929_vm0, %v928_v0  ;;  %v835_v6 = vld [vmem:[#allocation4 + $0x18] sm:$0xff]   ;;  %v836_v7 = vld [vmem:[#allocation4 + $0x20] sm:$0xff]   ;;  %v837_v8 = vld [vmem:[#allocation4 + $0x28] sm:$0xff]  }
  0x45   : > { %s1143_s9 = smov (!%p301_p5, %s703_s9), 3  ;;  %752 = vmatpush3.bf16.msra.mxu0 %v830_v1  ;;  %758 = vmatpush3.bf16.msra.mxu1 %v832_v3  ;;  %v838_v9 = vld [vmem:[#allocation4 + $0x30] sm:$0xff]   ;;  %v839_v10 = vld [vmem:[#allocation4 + $0x38] sm:$0xff]   ;;  %v841_v12 = vld [vmem:[%s1131_s5 + $0x8] sm:$0xff]  }
  0x46   : > { %s704_s28 = sshll.u32 %s1143_s9, 2  ;;  %777 = vmatprep.subr.bf16.mxu0 %v928_v0  ;;  %759 = vmatprep.subr.bf16.mxu1 %v928_v0  ;;  %v840_v11 = vld [vmem:[%s1131_s5] sm:$0xff]   ;;  %v842_v13 = vld [vmem:[%s1131_s5 + $0x10] sm:$0xff]   ;;  %v843_v14 = vld [vmem:[%s1131_s5 + $0x18] sm:$0xff]   ;;  %s706_s16 = sshll.u32 %s1143_s9, 3 }
  0x47   : > { %s304_s25 = scalar_lea.vmem %s1126_s0, %s704_s28  ;;  %v844_v15 = vld [vmem:[%s1131_s5 + $0x20] sm:$0xff]   ;;  %v845_v16 = vld [vmem:[%s1131_s5 + $0x28] sm:$0xff]   ;;  %v846_v27 = vld [vmem:[%s1131_s5 + $0x30] sm:$0xff]   ;;  %s310_s19 = scalar_lea.vmem %s1133_s7, %s706_s16 }
  0x48   : > { %v831_v2 = vld [vmem:[%s304_s25] sm:$0xff]   ;;  %v847_v28 = vld [vmem:[%s1131_s5 + $0x38] sm:$0xff]  }
  0x49   : > { %754 = vmatmul.mubr.msk.bf16.vlgmr.msra.gmra.mrb[0].mxu0 %vm335_vm1, %v831_v2  ;;  %760 = vmatpush3.bf16.msra.mxu1 %v833_v4  ;;  %v707_v17 = vld [vmem:[%s1128_s2] ss:$0 sm:$0xff] }
  0x4a   : > { %793 = vmatprep.mubr.msk.bf16.mxu0 %vm929_vm0, %v928_v0  ;;  %761 = vmatprep.subr.bf16.mxu1 %v928_v0  ;;  %v711_v29 = vld [vmem:[%s1130_s4] ss:$0 sm:$0xff] }
  0x4b   : > { %778 = vmatpush3.bf16.msra.mxu0 %v840_v11  ;;  %v720_v39 = vld [vmem:[%s1132_s6] ss:$0 sm:$0xff] }
  0x4c   : > { %779 = vmatprep.subr.bf16.mxu0 %v928_v0 }
  0x4d   : > { %762 = vmatpush3.bf16.msra.mxu1 %v834_v5 }
  0x4e   : > { %763 = vmatprep.subr.bf16.mxu1 %v928_v0 }
  0x4f   : > { %780 = vmatpush3.bf16.msra.mxu0 %v841_v12 }
  0x50   : > { %781 = vmatprep.subr.bf16.mxu0 %v928_v0 }
  0x51   : > { %764 = vmatpush3.bf16.msra.mxu1 %v835_v6 }
  0x52   : > { %765 = vmatprep.subr.bf16.mxu1 %v928_v0 }
  0x53   : > { %782 = vmatpush3.bf16.msra.mxu0 %v842_v13 }
  0x54   : > { %783 = vmatprep.subr.bf16.mxu0 %v928_v0 }
  0x55   : > { %766 = vmatpush3.bf16.msra.mxu1 %v836_v7 }
  0x56   : > { %767 = vmatprep.subr.bf16.mxu1 %v928_v0 }
  0x57   : > { %784 = vmatpush3.bf16.msra.mxu0 %v843_v14 }
  0x58   : > { %785 = vmatprep.subr.bf16.mxu0 %v928_v0 }
  0x59   : > { %768 = vmatpush3.bf16.msra.mxu1 %v837_v8 }
  0x5a   : > { %769 = vmatprep.subr.bf16.mxu1 %v928_v0 }
  0x5b   : > { %786 = vmatpush3.bf16.msra.mxu0 %v844_v15 }
  0x5c   : > { %787 = vmatprep.subr.bf16.mxu0 %v928_v0 }
  0x5d   : > { %770 = vmatpush3.bf16.msra.mxu1 %v838_v9 }
  0x5e   : > { %771 = vmatprep.subr.bf16.mxu1 %v928_v0 }
  0x5f   : > { %788 = vmatpush3.bf16.msra.mxu0 %v845_v16 }
  0x60   : > { %789 = vmatprep.subr.bf16.mxu0 %v928_v0 }
  0x61   : > { %772 = vmatpush3.bf16.msra.mxu1 %v839_v10 }
  0x63   : > { %790 = vmatpush3.bf16.msra.mxu0 %v846_v27 }
  0x64   : > { %791 = vmatprep.subr.bf16.mxu0 %v928_v0 }
  0x67   : > { %792 = vmatpush3.bf16.msra.mxu0 %v847_v28 }
 0x11c   : > { %v373_v18 = vpop.f32.mrb[0].mxu0 }
 0x11d   : > { %v374_v19 = vadd.f32 %v707_v17, %v373_v18  ;;  %v755_v20 = vpop.f32.mrb[1].mxu0 }
 0x11e   : > { %v376_v21 = vpop.f32.mrb[2].mxu0 }
 0x11f   : > { %v377_v22 = vadd.f32 %v707_v17, %v376_v21  ;;  %v756_v23 = vpop.f32.mrb[3].mxu0  ;;  %v380_v24 = vmax.f32 %v374_v19, 0.0 }
 0x121   : > { %v381_v25 = vmax.f32 %v377_v22, 0.0 }
 0x123   : > { %v382_v26 = vpack.c.bf16 %v381_v25, %v380_v24 }
 0x125   : > { %774 = vmatmul.mubr.bf16.vlgmr.msra.gmra.mrb[0].mxu1 %v382_v26 }
 0x1f8   : > { %v488_v30 = vpop.f32.mrb[0].mxu1 }
 0x1f9   : > { %v489_v31 = vadd.f32 %v711_v29, %v488_v30  ;;  %v775_v32 = vpop.f32.mrb[1].mxu1 }
 0x1fa   : > { %v491_v33 = vpop.f32.mrb[2].mxu1 }
 0x1fb   : > { %v492_v34 = vadd.f32 %v711_v29, %v491_v33  ;;  %v776_v35 = vpop.f32.mrb[3].mxu1  ;;  %v495_v36 = vmax.f32 %v489_v31, 0.0 }
 0x1fd   : > { %v496_v37 = vmax.f32 %v492_v34, 0.0 }
 0x1ff   : > { %v497_v38 = vpack.c.bf16 %v496_v37, %v495_v36 }
 0x201   : > { %794 = vmatmul.mubr.bf16.vlgmr.msra.gmra.mrb[4].mxu0 %v497_v38 }
 0x2d4   : > { %v603_v40 = vpop.f32.mrb[4].mxu0 }
 0x2d5   : > { %v604_v41 = vadd.f32 %v720_v39, %v603_v40  ;;  %v795_v42 = vpop.f32.mrb[5].mxu0 }
 0x2d6   : > { %v606_v43 = vpop.f32.mrb[6].mxu0 }
 0x2d7   : > { %848 = vtanh.f32 %v604_v41  ;;  %v607_v44 = vadd.f32 %v720_v39, %v606_v43  ;;  %v796_v45 = vpop.f32.mrb[7].mxu0 }
 0x2d9   : > { %850 = vtanh.f32 %v607_v44 }
 0x2e1   : > { %v849_v46 = vpop.eup %848 }
 0x2e2   : > { %v612_v47 = vmul.f32 0.1, %v849_v46 }
 0x2e3   : > { %v851_v48 = vpop.eup %850 }
 0x2e4   : > { %614 = vst [vmem:[%s310_s19] sm:$0xff] %v612_v47  ;;  %v613_v49 = vmul.f32 0.1, %v851_v48 }
 0x2e6   : > { %615 = vst [vmem:[%s310_s19 + $0x8] sm:$0xff] %v613_v49 }
 0x2e7 PF: > { %s19_s24 = sadd.s32 1, %s922_s24  }
 0x2e8   : > { %p16_p7 = scmp.ge.s32.totalorder %s19_s24, 4  }
 0x2ea   :  { %18 = sbr.rel (!%p16_p7) target bundleno = 2 (0x2), region = 87 }
 0x2f1   :  { %638 = vsyncpa [#allocation3], 1 }
 0x2f2   :  { %640 = vsyncpa [#allocation3 + $0x1], 1 }
 0x2f3   :  { %641 = vsyncpa [#allocation5], 1 }

</bundles_post_ra>
